<compile_context>
chip_gen: v7x
topology: tpu7x:2x2x1
jax: 0.10.0
libtpu: 0.0.40
codegen_flags: <defaults>
</compile_context>

<pallas_src>
import functools
import math

import jax
import jax.numpy as jnp
from jax.experimental import pallas as pl
from jax.experimental.pallas import tpu as pltpu

NUM_EMBEDDINGS = 300000
EMBEDDING_DIM = 1          # module default; sort over dim=1 == per-row top-k
TAKE_BEST = 6


def _round_up(x, m):
    return (x + m - 1) // m * m


def _loss_kernel(e_ref, res_ref, hw_ref, out_ref, *, take_best, batch,
                 block_b, chunk_b):
    """e_ref: (2T, block_b) f32 player scores — team-1 stacked over team-2 on
    the sublane axis, batch on lanes.  res_ref: (1, block_b) f32 result.
    hw_ref: (take_best,) f32 in SMEM.  out_ref: (1, block_b) f32 per-sample
    loss (0 for padding columns)."""
    two_t = e_ref.shape[0]
    T = two_t // 2
    i = pl.program_id(0)
    num_chunks = block_b // chunk_b

    # Hoisted once (JAX does not CSE broadcast_in_dim): sublane (player-slot)
    # iota, lane iota, and the head-weight scalars read from SMEM.
    slot = jax.lax.broadcasted_iota(jnp.int32, (T, chunk_b), 0)
    lane = jax.lax.broadcasted_iota(jnp.int32, (1, chunk_b), 1)
    hw = [hw_ref[j] for j in range(take_best)]

    def team_score(x):
        # Iterative descending top-k over the sublane axis, fused with the
        # linear head (no bias):  score = sum_j hw[j] * sorted_desc(x)[j].
        acc = jnp.zeros((1, chunk_b), jnp.float32)
        for j in range(take_best):
            m = jnp.max(x, axis=0, keepdims=True)                 # (1, Cb)
            acc = acc + hw[j] * m
            # Knock out only the FIRST occurrence of the max (same result a
            # sort-then-slice gives, including for duplicate values).
            eligible = x == m
            first = jnp.min(jnp.where(eligible, slot, T), axis=0,
                            keepdims=True)                        # (1, Cb)
            x = jnp.where(slot == first, -jnp.inf, x)
        return acc                                                # (1, Cb)

    def chunk_body(c, carry):
        start = pl.multiple_of(c * chunk_b, chunk_b)
        e = e_ref[:, pl.ds(start, chunk_b)]                       # (2T, Cb)
        s1 = team_score(e[:T, :])
        s2 = team_score(e[T:, :])
        delta = s1 - s2                                           # (1, Cb)
        res = res_ref[:, pl.ds(start, chunk_b)]                   # (1, Cb)
        # loss == 'sigmoid': |2*sigmoid(d) - 1 - r| == |tanh(d/2) - r|
        score = jnp.abs(jnp.tanh(0.5 * delta) - res)
        # Zero out padding columns so the wrapper's sum / B is an exact mean.
        col = i * block_b + start + lane
        out_ref[:, pl.ds(start, chunk_b)] = jnp.where(col < batch, score, 0.0)
        return carry

    # Lane-chunked inner loop keeps the live (2T, chunk_b) working set at a
    # handful of vregs even for block_b of 1024-2048.
    jax.lax.fori_loop(0, num_chunks, chunk_body, 0, unroll=True)


def model_forward(emb_table, head_w, team_1, team_2, result, *,
                  block_b=None, chunk_b=256):
    """emb_table: (NUM_EMBEDDINGS, 1) f32, head_w: (1, take_best) f32,
    team_1/team_2: (B, T) int32, result: (B, 1) f32 in {-1, 0, 1}."""
    B, T = team_1.shape
    take_best = head_w.shape[-1]

    if block_b is None:
        # Large blocks amortize per-grid-step overhead; cap at ~half the
        # batch (rounded to full lanes) so there are >=2 grid blocks and both
        # TensorCores get work on v7x.  1024 also keeps v5e near roofline.
        block_b = min(1024, _round_up(pl.cdiv(B, 2), 128))
    block_b = max(128, _round_up(block_b, 128))
    chunk_b = max(128, min(chunk_b, block_b))
    chunk_b = math.gcd(block_b, chunk_b)       # multiple of 128, divides block_b
    b_pad = _round_up(B, block_b)
    num_blocks = b_pad // block_b

    # XLA glue: embedding gather + transpose to the lane-dense layout, with
    # team-1 / team-2 stacked on the sublane axis so each grid step issues a
    # single input DMA.  Padded batch columns use index 0 and are masked
    # inside the kernel.
    teams = jnp.concatenate([team_1, team_2], axis=1)             # (B, 2T)
    idx = jnp.pad(jnp.transpose(teams, (1, 0)), ((0, 0), (0, b_pad - B)))
    e = emb_table[idx, 0].astype(jnp.float32)                     # (2T, b_pad)
    res = jnp.pad(jnp.reshape(result.astype(jnp.float32), (1, B)),
                  ((0, 0), (0, b_pad - B)))                       # (1, b_pad)
    hw = jnp.reshape(head_w.astype(jnp.float32), (take_best,))    # 1-D SMEM

    kernel = functools.partial(_loss_kernel, take_best=take_best, batch=B,
                               block_b=block_b, chunk_b=chunk_b)
    per_sample = pl.pallas_call(
        kernel,
        out_shape=jax.ShapeDtypeStruct((1, b_pad), jnp.float32),
        grid=(num_blocks,),
        in_specs=[
            pl.BlockSpec((2 * T, block_b), lambda i: (0, i)),     # stacked e
            pl.BlockSpec((1, block_b), lambda i: (0, i)),         # result
            pl.BlockSpec(memory_space=pltpu.MemorySpace.SMEM),    # head weight
        ],
        out_specs=pl.BlockSpec((1, block_b), lambda i: (0, i)),
        compiler_params=pltpu.CompilerParams(
            dimension_semantics=("parallel",),
            allow_input_fusion=[True, True, False],
            vmem_limit_bytes=64 * 1024 * 1024),
    )(e, res, hw)
    return jnp.sum(per_sample) / B


def reference_forward(emb_table, head_w, team_1, team_2, result):
    """Pure-JAX reference mirroring the PyTorch forward."""
    take_best = head_w.shape[-1]

    def team_score(team):
        e = emb_table[team, 0]                                    # (B, T)
        top = jnp.sort(e, axis=1)[:, ::-1][:, :take_best]         # (B, k)
        return top @ head_w.T                                     # (B, 1)

    delta = team_score(team_1) - team_score(team_2)
    return jnp.mean(jnp.abs(jax.nn.sigmoid(delta) * 2.0 - 1.0 - result))


if __name__ == "__main__":
    B, T = 200, 16   # teams per batch, players per team (T >= take_best)

    key = jax.random.PRNGKey(0)
    k_emb, k_t1, k_t2, k_res = jax.random.split(key, 4)

    # Module __init__ zero-inits the embedding (degenerate forward); use a
    # small deterministic random table so the top-k path is exercised.
    emb_table = (0.1 * jax.random.normal(
        k_emb, (NUM_EMBEDDINGS, EMBEDDING_DIM))).astype(jnp.float32)
    # Head weight exactly as in __init__: constant 1 / take_best, no bias.
    head_w = jnp.full((1, TAKE_BEST), 1.0 / TAKE_BEST, dtype=jnp.float32)

    team_1 = jax.random.randint(k_t1, (B, T), 0, NUM_EMBEDDINGS, dtype=jnp.int32)
    team_2 = jax.random.randint(k_t2, (B, T), 0, NUM_EMBEDDINGS, dtype=jnp.int32)
    result = jax.random.randint(k_res, (B, 1), -1, 2).astype(jnp.float32)

    ref = jax.block_until_ready(
        reference_forward(emb_table, head_w, team_1, team_2, result))

    # Default config: block_b resolves to 128 here -> 2 grid blocks (second
    # one partially masked), exercising the parallel batch grid + padding.
    loss = jax.block_until_ready(jax.jit(model_forward)(
        emb_table, head_w, team_1, team_2, result))
    assert jnp.allclose(loss, ref, atol=1e-5, rtol=1e-5), (loss, ref)

    # Larger block with the inner lane-chunk loop (1 block, 2 chunks of 128
    # lanes, second chunk partially masked).
    fwd2 = jax.jit(functools.partial(model_forward, block_b=256, chunk_b=128))
    loss2 = jax.block_until_ready(
        fwd2(emb_table, head_w, team_1, team_2, result))
    assert jnp.allclose(loss2, ref, atol=1e-5, rtol=1e-5), (loss2, ref)

    print("KERNEL_OK")
</pallas_src>

<mosaic_0001>
module attributes {stable_mosaic.version = 11 : i64} {
  func.func private @main(%arg0: i32) attributes {dimension_semantics = [#tpu.dimension_semantics<core_parallel>], iteration_bounds = array<i64: 2>, tpu.core_type = #tpu.core_type<sc_scalar_subcore>, window_params = []} {
    return
  }
}

module attributes {stable_mosaic.version = 11 : i64} {
  func.func private @main(%arg0: i32) attributes {dimension_semantics = [#tpu.dimension_semantics<core_parallel>], iteration_bounds = array<i64: 2>, tpu.core_type = #tpu.core_type<sc_scalar_subcore>, window_params = []} {
    return
  }
}

module attributes {stable_mosaic.version = 11 : i64} {
  func.func @_loss_kernel(%arg0: i32, %arg1: memref<32x128xf32, #tpu.memory_space<vmem>>, %arg2: memref<1x128xf32, #tpu.memory_space<vmem>>, %arg3: memref<6xf32, #tpu.memory_space<smem>>, %arg4: memref<1x128xf32, #tpu.memory_space<vmem>>) attributes {dimension_semantics = [#tpu.dimension_semantics<parallel>], iteration_bounds = array<i64: 2>, scalar_prefetch = 0 : i64, scratch_operands = 0 : i64, tpu.core_type = #tpu.core_type<tc>, window_params = [{transform_indices = @transform_0, window_bounds = array<i64: 32, 128>}, {transform_indices = @transform_1, window_bounds = array<i64: 1, 128>}, {transform_indices = @transform_2, window_bounds = array<i64: 6>}, {transform_indices = @transform_3, window_bounds = array<i64: 1, 128>}]} {
    %0 = tpu.iota {dimensions = array<i32: 0>} : vector<16x128xi32>
    %1 = tpu.iota {dimensions = array<i32: 1>} : vector<1x128xi32>
    %c0 = arith.constant 0 : index
    %2 = memref.load %arg3[%c0] : memref<6xf32, #tpu.memory_space<smem>>
    %c1 = arith.constant 1 : index
    %3 = memref.load %arg3[%c1] : memref<6xf32, #tpu.memory_space<smem>>
    %c2 = arith.constant 2 : index
    %4 = memref.load %arg3[%c2] : memref<6xf32, #tpu.memory_space<smem>>
    %c3 = arith.constant 3 : index
    %5 = memref.load %arg3[%c3] : memref<6xf32, #tpu.memory_space<smem>>
    %c4 = arith.constant 4 : index
    %6 = memref.load %arg3[%c4] : memref<6xf32, #tpu.memory_space<smem>>
    %c5 = arith.constant 5 : index
    %7 = memref.load %arg3[%c5] : memref<6xf32, #tpu.memory_space<smem>>
    %c0_i32 = arith.constant 0 : i32
    %c128_i32 = arith.constant 128 : i32
    %8 = arith.muli %c0_i32, %c128_i32 : i32
    %9 = tpu.assume_multiple %8, 128 : i32
    %c0_0 = arith.constant 0 : index
    %10 = arith.index_cast %9 : i32 to index
    %11 = vector.load %arg1[%c0_0, %10] : memref<32x128xf32, #tpu.memory_space<vmem>>, vector<32x128xf32>
    %12 = vector.extract_strided_slice %11 {offsets = [0, 0], sizes = [16, 128], strides = [1, 1]} : vector<32x128xf32> to vector<16x128xf32>
    %cst = arith.constant 0.000000e+00 : f32
    %13 = vector.broadcast %cst : f32 to vector<1x128xf32>
    %cst_1 = arith.constant dense<0xFF800000> : vector<128xf32>
    %14 = vector.multi_reduction <maximumf>, %12, %cst_1 [0] : vector<16x128xf32> to vector<128xf32>
    %15 = vector.shape_cast %14 : vector<128xf32> to vector<1x128xf32>
    %16 = vector.broadcast %2 : f32 to vector<1x128xf32>
    %17 = arith.mulf %16, %15 : vector<1x128xf32>
    %18 = arith.addf %13, %17 : vector<1x128xf32>
    %19 = vector.broadcast %15 : vector<1x128xf32> to vector<16x128xf32>
    %20 = arith.cmpf oeq, %12, %19 : vector<16x128xf32>
    %c16_i32 = arith.constant 16 : i32
    %21 = vector.broadcast %c16_i32 : i32 to vector<16x128xi32>
    %22 = arith.select %20, %0, %21 : vector<16x128xi1>, vector<16x128xi32>
    %cst_2 = arith.constant dense<2147483647> : vector<128xi32>
    %23 = vector.multi_reduction <minsi>, %22, %cst_2 [0] : vector<16x128xi32> to vector<128xi32>
    %24 = vector.shape_cast %23 : vector<128xi32> to vector<1x128xi32>
    %25 = vector.broadcast %24 : vector<1x128xi32> to vector<16x128xi32>
    %26 = arith.cmpi eq, %0, %25 : vector<16x128xi32>
    %cst_3 = arith.constant 0xFF800000 : f32
    %27 = vector.broadcast %cst_3 : f32 to vector<16x128xf32>
    %28 = arith.select %26, %27, %12 : vector<16x128xi1>, vector<16x128xf32>
    %cst_4 = arith.constant dense<0xFF800000> : vector<128xf32>
    %29 = vector.multi_reduction <maximumf>, %28, %cst_4 [0] : vector<16x128xf32> to vector<128xf32>
    %30 = vector.shape_cast %29 : vector<128xf32> to vector<1x128xf32>
    %31 = vector.broadcast %3 : f32 to vector<1x128xf32>
    %32 = arith.mulf %31, %30 : vector<1x128xf32>
    %33 = arith.addf %18, %32 : vector<1x128xf32>
    %34 = vector.broadcast %30 : vector<1x128xf32> to vector<16x128xf32>
    %35 = arith.cmpf oeq, %28, %34 : vector<16x128xf32>
    %c16_i32_5 = arith.constant 16 : i32
    %36 = vector.broadcast %c16_i32_5 : i32 to vector<16x128xi32>
    %37 = arith.select %35, %0, %36 : vector<16x128xi1>, vector<16x128xi32>
    %cst_6 = arith.constant dense<2147483647> : vector<128xi32>
    %38 = vector.multi_reduction <minsi>, %37, %cst_6 [0] : vector<16x128xi32> to vector<128xi32>
    %39 = vector.shape_cast %38 : vector<128xi32> to vector<1x128xi32>
    %40 = vector.broadcast %39 : vector<1x128xi32> to vector<16x128xi32>
    %41 = arith.cmpi eq, %0, %40 : vector<16x128xi32>
    %cst_7 = arith.constant 0xFF800000 : f32
    %42 = vector.broadcast %cst_7 : f32 to vector<16x128xf32>
    %43 = arith.select %41, %42, %28 : vector<16x128xi1>, vector<16x128xf32>
    %cst_8 = arith.constant dense<0xFF800000> : vector<128xf32>
    %44 = vector.multi_reduction <maximumf>, %43, %cst_8 [0] : vector<16x128xf32> to vector<128xf32>
    %45 = vector.shape_cast %44 : vector<128xf32> to vector<1x128xf32>
    %46 = vector.broadcast %4 : f32 to vector<1x128xf32>
    %47 = arith.mulf %46, %45 : vector<1x128xf32>
    %48 = arith.addf %33, %47 : vector<1x128xf32>
    %49 = vector.broadcast %45 : vector<1x128xf32> to vector<16x128xf32>
    %50 = arith.cmpf oeq, %43, %49 : vector<16x128xf32>
    %c16_i32_9 = arith.constant 16 : i32
    %51 = vector.broadcast %c16_i32_9 : i32 to vector<16x128xi32>
    %52 = arith.select %50, %0, %51 : vector<16x128xi1>, vector<16x128xi32>
    %cst_10 = arith.constant dense<2147483647> : vector<128xi32>
    %53 = vector.multi_reduction <minsi>, %52, %cst_10 [0] : vector<16x128xi32> to vector<128xi32>
    %54 = vector.shape_cast %53 : vector<128xi32> to vector<1x128xi32>
    %55 = vector.broadcast %54 : vector<1x128xi32> to vector<16x128xi32>
    %56 = arith.cmpi eq, %0, %55 : vector<16x128xi32>
    %cst_11 = arith.constant 0xFF800000 : f32
    %57 = vector.broadcast %cst_11 : f32 to vector<16x128xf32>
    %58 = arith.select %56, %57, %43 : vector<16x128xi1>, vector<16x128xf32>
    %cst_12 = arith.constant dense<0xFF800000> : vector<128xf32>
    %59 = vector.multi_reduction <maximumf>, %58, %cst_12 [0] : vector<16x128xf32> to vector<128xf32>
    %60 = vector.shape_cast %59 : vector<128xf32> to vector<1x128xf32>
    %61 = vector.broadcast %5 : f32 to vector<1x128xf32>
    %62 = arith.mulf %61, %60 : vector<1x128xf32>
    %63 = arith.addf %48, %62 : vector<1x128xf32>
    %64 = vector.broadcast %60 : vector<1x128xf32> to vector<16x128xf32>
    %65 = arith.cmpf oeq, %58, %64 : vector<16x128xf32>
    %c16_i32_13 = arith.constant 16 : i32
    %66 = vector.broadcast %c16_i32_13 : i32 to vector<16x128xi32>
    %67 = arith.select %65, %0, %66 : vector<16x128xi1>, vector<16x128xi32>
    %cst_14 = arith.constant dense<2147483647> : vector<128xi32>
    %68 = vector.multi_reduction <minsi>, %67, %cst_14 [0] : vector<16x128xi32> to vector<128xi32>
    %69 = vector.shape_cast %68 : vector<128xi32> to vector<1x128xi32>
    %70 = vector.broadcast %69 : vector<1x128xi32> to vector<16x128xi32>
    %71 = arith.cmpi eq, %0, %70 : vector<16x128xi32>
    %cst_15 = arith.constant 0xFF800000 : f32
    %72 = vector.broadcast %cst_15 : f32 to vector<16x128xf32>
    %73 = arith.select %71, %72, %58 : vector<16x128xi1>, vector<16x128xf32>
    %cst_16 = arith.constant dense<0xFF800000> : vector<128xf32>
    %74 = vector.multi_reduction <maximumf>, %73, %cst_16 [0] : vector<16x128xf32> to vector<128xf32>
    %75 = vector.shape_cast %74 : vector<128xf32> to vector<1x128xf32>
    %76 = vector.broadcast %6 : f32 to vector<1x128xf32>
    %77 = arith.mulf %76, %75 : vector<1x128xf32>
    %78 = arith.addf %63, %77 : vector<1x128xf32>
    %79 = vector.broadcast %75 : vector<1x128xf32> to vector<16x128xf32>
    %80 = arith.cmpf oeq, %73, %79 : vector<16x128xf32>
    %c16_i32_17 = arith.constant 16 : i32
    %81 = vector.broadcast %c16_i32_17 : i32 to vector<16x128xi32>
    %82 = arith.select %80, %0, %81 : vector<16x128xi1>, vector<16x128xi32>
    %cst_18 = arith.constant dense<2147483647> : vector<128xi32>
    %83 = vector.multi_reduction <minsi>, %82, %cst_18 [0] : vector<16x128xi32> to vector<128xi32>
    %84 = vector.shape_cast %83 : vector<128xi32> to vector<1x128xi32>
    %85 = vector.broadcast %84 : vector<1x128xi32> to vector<16x128xi32>
    %86 = arith.cmpi eq, %0, %85 : vector<16x128xi32>
    %cst_19 = arith.constant 0xFF800000 : f32
    %87 = vector.broadcast %cst_19 : f32 to vector<16x128xf32>
    %88 = arith.select %86, %87, %73 : vector<16x128xi1>, vector<16x128xf32>
    %cst_20 = arith.constant dense<0xFF800000> : vector<128xf32>
    %89 = vector.multi_reduction <maximumf>, %88, %cst_20 [0] : vector<16x128xf32> to vector<128xf32>
    %90 = vector.shape_cast %89 : vector<128xf32> to vector<1x128xf32>
    %91 = vector.broadcast %7 : f32 to vector<1x128xf32>
    %92 = arith.mulf %91, %90 : vector<1x128xf32>
    %93 = arith.addf %78, %92 : vector<1x128xf32>
    %94 = vector.extract_strided_slice %11 {offsets = [16, 0], sizes = [16, 128], strides = [1, 1]} : vector<32x128xf32> to vector<16x128xf32>
    %cst_21 = arith.constant 0.000000e+00 : f32
    %95 = vector.broadcast %cst_21 : f32 to vector<1x128xf32>
    %cst_22 = arith.constant dense<0xFF800000> : vector<128xf32>
    %96 = vector.multi_reduction <maximumf>, %94, %cst_22 [0] : vector<16x128xf32> to vector<128xf32>
    %97 = vector.shape_cast %96 : vector<128xf32> to vector<1x128xf32>
    %98 = vector.broadcast %2 : f32 to vector<1x128xf32>
    %99 = arith.mulf %98, %97 : vector<1x128xf32>
    %100 = arith.addf %95, %99 : vector<1x128xf32>
    %101 = vector.broadcast %97 : vector<1x128xf32> to vector<16x128xf32>
    %102 = arith.cmpf oeq, %94, %101 : vector<16x128xf32>
    %c16_i32_23 = arith.constant 16 : i32
    %103 = vector.broadcast %c16_i32_23 : i32 to vector<16x128xi32>
    %104 = arith.select %102, %0, %103 : vector<16x128xi1>, vector<16x128xi32>
    %cst_24 = arith.constant dense<2147483647> : vector<128xi32>
    %105 = vector.multi_reduction <minsi>, %104, %cst_24 [0] : vector<16x128xi32> to vector<128xi32>
    %106 = vector.shape_cast %105 : vector<128xi32> to vector<1x128xi32>
    %107 = vector.broadcast %106 : vector<1x128xi32> to vector<16x128xi32>
    %108 = arith.cmpi eq, %0, %107 : vector<16x128xi32>
    %cst_25 = arith.constant 0xFF800000 : f32
    %109 = vector.broadcast %cst_25 : f32 to vector<16x128xf32>
    %110 = arith.select %108, %109, %94 : vector<16x128xi1>, vector<16x128xf32>
    %cst_26 = arith.constant dense<0xFF800000> : vector<128xf32>
    %111 = vector.multi_reduction <maximumf>, %110, %cst_26 [0] : vector<16x128xf32> to vector<128xf32>
    %112 = vector.shape_cast %111 : vector<128xf32> to vector<1x128xf32>
    %113 = vector.broadcast %3 : f32 to vector<1x128xf32>
    %114 = arith.mulf %113, %112 : vector<1x128xf32>
    %115 = arith.addf %100, %114 : vector<1x128xf32>
    %116 = vector.broadcast %112 : vector<1x128xf32> to vector<16x128xf32>
    %117 = arith.cmpf oeq, %110, %116 : vector<16x128xf32>
    %c16_i32_27 = arith.constant 16 : i32
    %118 = vector.broadcast %c16_i32_27 : i32 to vector<16x128xi32>
    %119 = arith.select %117, %0, %118 : vector<16x128xi1>, vector<16x128xi32>
    %cst_28 = arith.constant dense<2147483647> : vector<128xi32>
    %120 = vector.multi_reduction <minsi>, %119, %cst_28 [0] : vector<16x128xi32> to vector<128xi32>
    %121 = vector.shape_cast %120 : vector<128xi32> to vector<1x128xi32>
    %122 = vector.broadcast %121 : vector<1x128xi32> to vector<16x128xi32>
    %123 = arith.cmpi eq, %0, %122 : vector<16x128xi32>
    %cst_29 = arith.constant 0xFF800000 : f32
    %124 = vector.broadcast %cst_29 : f32 to vector<16x128xf32>
    %125 = arith.select %123, %124, %110 : vector<16x128xi1>, vector<16x128xf32>
    %cst_30 = arith.constant dense<0xFF800000> : vector<128xf32>
    %126 = vector.multi_reduction <maximumf>, %125, %cst_30 [0] : vector<16x128xf32> to vector<128xf32>
    %127 = vector.shape_cast %126 : vector<128xf32> to vector<1x128xf32>
    %128 = vector.broadcast %4 : f32 to vector<1x128xf32>
    %129 = arith.mulf %128, %127 : vector<1x128xf32>
    %130 = arith.addf %115, %129 : vector<1x128xf32>
    %131 = vector.broadcast %127 : vector<1x128xf32> to vector<16x128xf32>
    %132 = arith.cmpf oeq, %125, %131 : vector<16x128xf32>
    %c16_i32_31 = arith.constant 16 : i32
    %133 = vector.broadcast %c16_i32_31 : i32 to vector<16x128xi32>
    %134 = arith.select %132, %0, %133 : vector<16x128xi1>, vector<16x128xi32>
    %cst_32 = arith.constant dense<2147483647> : vector<128xi32>
    %135 = vector.multi_reduction <minsi>, %134, %cst_32 [0] : vector<16x128xi32> to vector<128xi32>
    %136 = vector.shape_cast %135 : vector<128xi32> to vector<1x128xi32>
    %137 = vector.broadcast %136 : vector<1x128xi32> to vector<16x128xi32>
    %138 = arith.cmpi eq, %0, %137 : vector<16x128xi32>
    %cst_33 = arith.constant 0xFF800000 : f32
    %139 = vector.broadcast %cst_33 : f32 to vector<16x128xf32>
    %140 = arith.select %138, %139, %125 : vector<16x128xi1>, vector<16x128xf32>
    %cst_34 = arith.constant dense<0xFF800000> : vector<128xf32>
    %141 = vector.multi_reduction <maximumf>, %140, %cst_34 [0] : vector<16x128xf32> to vector<128xf32>
    %142 = vector.shape_cast %141 : vector<128xf32> to vector<1x128xf32>
    %143 = vector.broadcast %5 : f32 to vector<1x128xf32>
    %144 = arith.mulf %143, %142 : vector<1x128xf32>
    %145 = arith.addf %130, %144 : vector<1x128xf32>
    %146 = vector.broadcast %142 : vector<1x128xf32> to vector<16x128xf32>
    %147 = arith.cmpf oeq, %140, %146 : vector<16x128xf32>
    %c16_i32_35 = arith.constant 16 : i32
    %148 = vector.broadcast %c16_i32_35 : i32 to vector<16x128xi32>
    %149 = arith.select %147, %0, %148 : vector<16x128xi1>, vector<16x128xi32>
    %cst_36 = arith.constant dense<2147483647> : vector<128xi32>
    %150 = vector.multi_reduction <minsi>, %149, %cst_36 [0] : vector<16x128xi32> to vector<128xi32>
    %151 = vector.shape_cast %150 : vector<128xi32> to vector<1x128xi32>
    %152 = vector.broadcast %151 : vector<1x128xi32> to vector<16x128xi32>
    %153 = arith.cmpi eq, %0, %152 : vector<16x128xi32>
    %cst_37 = arith.constant 0xFF800000 : f32
    %154 = vector.broadcast %cst_37 : f32 to vector<16x128xf32>
    %155 = arith.select %153, %154, %140 : vector<16x128xi1>, vector<16x128xf32>
    %cst_38 = arith.constant dense<0xFF800000> : vector<128xf32>
    %156 = vector.multi_reduction <maximumf>, %155, %cst_38 [0] : vector<16x128xf32> to vector<128xf32>
    %157 = vector.shape_cast %156 : vector<128xf32> to vector<1x128xf32>
    %158 = vector.broadcast %6 : f32 to vector<1x128xf32>
    %159 = arith.mulf %158, %157 : vector<1x128xf32>
    %160 = arith.addf %145, %159 : vector<1x128xf32>
    %161 = vector.broadcast %157 : vector<1x128xf32> to vector<16x128xf32>
    %162 = arith.cmpf oeq, %155, %161 : vector<16x128xf32>
    %c16_i32_39 = arith.constant 16 : i32
    %163 = vector.broadcast %c16_i32_39 : i32 to vector<16x128xi32>
    %164 = arith.select %162, %0, %163 : vector<16x128xi1>, vector<16x128xi32>
    %cst_40 = arith.constant dense<2147483647> : vector<128xi32>
    %165 = vector.multi_reduction <minsi>, %164, %cst_40 [0] : vector<16x128xi32> to vector<128xi32>
    %166 = vector.shape_cast %165 : vector<128xi32> to vector<1x128xi32>
    %167 = vector.broadcast %166 : vector<1x128xi32> to vector<16x128xi32>
    %168 = arith.cmpi eq, %0, %167 : vector<16x128xi32>
    %cst_41 = arith.constant 0xFF800000 : f32
    %169 = vector.broadcast %cst_41 : f32 to vector<16x128xf32>
    %170 = arith.select %168, %169, %155 : vector<16x128xi1>, vector<16x128xf32>
    %cst_42 = arith.constant dense<0xFF800000> : vector<128xf32>
    %171 = vector.multi_reduction <maximumf>, %170, %cst_42 [0] : vector<16x128xf32> to vector<128xf32>
    %172 = vector.shape_cast %171 : vector<128xf32> to vector<1x128xf32>
    %173 = vector.broadcast %7 : f32 to vector<1x128xf32>
    %174 = arith.mulf %173, %172 : vector<1x128xf32>
    %175 = arith.addf %160, %174 : vector<1x128xf32>
    %176 = arith.subf %93, %175 : vector<1x128xf32>
    %c0_43 = arith.constant 0 : index
    %177 = arith.index_cast %9 : i32 to index
    %178 = vector.load %arg2[%c0_43, %177] : memref<1x128xf32, #tpu.memory_space<vmem>>, vector<1x128xf32>
    %cst_44 = arith.constant 5.000000e-01 : f32
    %179 = vector.broadcast %cst_44 : f32 to vector<1x128xf32>
    %180 = arith.mulf %179, %176 : vector<1x128xf32>
    %181 = math.tanh %180 : vector<1x128xf32>
    %182 = arith.subf %181, %178 : vector<1x128xf32>
    %183 = math.absf %182 : vector<1x128xf32>
    %c128_i32_45 = arith.constant 128 : i32
    %184 = arith.muli %arg0, %c128_i32_45 : i32
    %185 = arith.addi %184, %9 : i32
    %186 = vector.broadcast %185 : i32 to vector<1x128xi32>
    %187 = arith.addi %186, %1 : vector<1x128xi32>
    %c200_i32 = arith.constant 200 : i32
    %188 = vector.broadcast %c200_i32 : i32 to vector<1x128xi32>
    %189 = arith.cmpi slt, %187, %188 : vector<1x128xi32>
    %cst_46 = arith.constant 0.000000e+00 : f32
    %190 = vector.broadcast %cst_46 : f32 to vector<1x128xf32>
    %191 = arith.select %189, %183, %190 : vector<1x128xi1>, vector<1x128xf32>
    %c0_47 = arith.constant 0 : index
    %192 = arith.index_cast %9 : i32 to index
    %193 = vector.load %arg4[%c0_47, %192] : memref<1x128xf32, #tpu.memory_space<vmem>>, vector<1x128xf32>
    tpu.vector_store %arg4[%c0_47, %192], %191 {strides = array<i32>} : memref<1x128xf32, #tpu.memory_space<vmem>>, vector<1x128xf32>,
    %c1_i32 = arith.constant 1 : i32
    return
  }
  func.func @transform_0(%arg0: i32) -> (i32, i32) {
    %c0_i32 = arith.constant 0 : i32
    %c0_i32_0 = arith.constant 0 : i32
    return %c0_i32, %arg0 : i32, i32
  }
  func.func @transform_1(%arg0: i32) -> (i32, i32) {
    %c0_i32 = arith.constant 0 : i32
    %c0_i32_0 = arith.constant 0 : i32
    return %c0_i32, %arg0 : i32, i32
  }
  func.func @transform_2(%arg0: i32) -> i32 {
    %c0_i32 = arith.constant 0 : i32
    %c0_i32_0 = arith.constant 0 : i32
    return %c0_i32 : i32
  }
  func.func @transform_3(%arg0: i32) -> (i32, i32) {
    %c0_i32 = arith.constant 0 : i32
    %c0_i32_0 = arith.constant 0 : i32
    return %c0_i32, %arg0 : i32, i32
  }
}

</mosaic_0001>

<bundles_post_ra>
// kernel: model_forward.2
= control target key start
LH: loop header
LB: loop body
LE: loop exit
PB: predicated region body
PF: predicated region fallthrough
CT: control target
= control target key end

     0   :  { %s1008_s0 = inlined_call_operand.vmem [shape: f32[32,256], index: 0, kind: input, shape index: {}]   ;;  %s1009_s1 = inlined_call_operand.vmem [shape: f32[6], index: 1, kind: input, shape index: {}]   ;;  %s1010_s2 = inlined_call_operand.vmem [shape: f32[1,200], index: 2, kind: input, shape index: {}]   ;;  %s1011_s3 = inlined_call_operand.<no memory space> [shape: f32[], index: 3, kind: input, shape index: {}]   ;;  %s1012_s4 = inlined_call_operand.vmem [shape: f32[1,256], index: 4, kind: output, shape index: {}]  }
   0x1   :  { %v821_v0 = vstv %s1011_s3 }
   0x2   :  { %10 = vsyncpa [#allocation9], 0  ;;  %s823_s17 = smov 0   ;;  %s825_s18 = smov 0  }
   0x3   :  { %s827_s19 = smov 0  }
   0x4 LB: > { %s839_s3 = sadd.s32 4294967295, %s790_s19   ;;  %s842_s20 = sadd.s32 1, %s790_s19   ;;  %s790_s19 = sphi %s827_s19, %s1018_s19   ;;  %s786_s18 = sphi %s825_s18, %s1017_s18   ;;  %s782_s17 = sphi %s823_s17, %s1016_s17  }
   0x5   : > { %s20_s21 = ssub.s32 %s790_s19, %s842_s20  ;;  %s23_s22 = sadd.s32 1, %s786_s18 }
   0x6   : > { %p21_p0 = scmp.eq.s32.totalorder %s20_s21, 0  ;;  %p30_p1 = scmp.ne.s32.totalorder %s786_s18, %s782_s17 }
   0x7   : > { %p31_p2 = scmp.eq.s32.totalorder %s790_s19, 0  ;;  %p695_p3 = scmp.ge.s32.totalorder %s790_s19, 1 }
   0x8   : > { %s852_s23 = scalar_select %p21_p0, %s786_s18, %s23_s22  }
   0x9   : > { %p854_p4 = por %p31_p2, %p30_p1  ;;  %p120_p5 = scmp.lt.s32.totalorder %s790_s19, 3 }
   0xa   : > { %p720_p6 = scmp.eq.s32.totalorder %s839_s3, 0  ;;  %s133_s28 = sshll.u32 %s1009_s1, 4  ;;  %s134_s28 = int_to_ptr.vmem [resolvable:$true] %s133_s28 }
   0xb   : > { %p860_p7 = pnand %p695_p3, %p120_p5  ;;  %s749_s29 = scalar_lea.vmem %s134_s28, 16 }
   0xc   : > { %p750_p10 = scmp.ne.s32.totalorder %s134_s28, %s749_s29  ;;  %p757_p0 = scmp.lt.s32.totalorder %s134_s28, %s134_s28 }
   0xd   : > { %p716_p8 = pneg %p860_p7  ;;  %p758_p1 = scmp.lt.s32.totalorder %s749_s29, %s749_s29 }
   0xf   : > { %p717_p9 = pnand %p720_p6, %p716_p8  ;;  %p759_p2 = por %p758_p1, %p757_p0 }
  0x11   : > { %p751_p11 = pneg %p717_p9 }
  0x13   : > { %p752_p12 = pnand %p751_p11, %p750_p10 }
  0x15   : > { %p753_p13 = pneg %p752_p12 }
  0x17   : > { %p760_p3 = pnand %p759_p2, %p753_p13 }
  0x19   : > { %763 = shalt.err (!%p760_p3)
}
  0x1a   : > { %s792_s30 = smov [#allocation8]   ;;  %p697_p5 = scmp.ge.s32.totalorder %s790_s19, 2 }
  0x1b   : > { %719 = dma.vmem_to_smem (!%p717_p9), %s134_s28, 16, %s792_s30, [#allocation9]  }
  0x1c   : > { %140 = sbr.rel (%p697_p5) target bundleno = 42 (0x2a), region = 20 }
  0x23   : > { %143 = sbr.rel (!%p854_p4) target bundleno = 42 (0x2a), region = 24  ;;  %s145_s5 = sand.u32 (%p854_p4), 1, %s786_s18  }
  0x24   : > { %s699_s6 = sshll.u32 (%p854_p4), %s790_s19, 3  ;;  %s698_s7 = sshll.u32 (%p854_p4), %s145_s5, 5 }
  0x25   : > { %s149_s10 = scalar_lea.vmem (%p854_p4), %s1008_s0, %s699_s6  ;;  %s147_s11 = scalar_lea.vmem (%p854_p4), [#allocation7], %s698_s7 }
  0x26   : > { %v183_v1 = vld [vmem:[%s149_s10] sm:$0xff] (%p854_p4)  ;;  %v185_v2 = vld [vmem:[%s149_s10 + $0x10] sm:$0xff] (%p854_p4) }
  0x27   : > { %v187_v3 = vld [vmem:[%s149_s10 + $0x20] sm:$0xff] (%p854_p4)  ;;  %184 = vst [vmem:[%s147_s11] sm:$0xff] (%p854_p4), %v183_v1  ;;  %186 = vst [vmem:[%s147_s11 + $0x8] sm:$0xff] (%p854_p4), %v185_v2  ;;  %v189_v4 = vld [vmem:[%s149_s10 + $0x30] sm:$0xff] (%p854_p4) }
  0x28   : > { %188 = vst [vmem:[%s147_s11 + $0x10] sm:$0xff] (%p854_p4), %v187_v3  ;;  %190 = vst [vmem:[%s147_s11 + $0x18] sm:$0xff] (%p854_p4), %v189_v4 }
  0x2a PF: > { %213 = sbr.rel (%p860_p7) target bundleno = 258 (0x102), region = 66 }
  0x31   : > { %s216_s12 = sand.u32 1, %s782_s17  }
  0x32   : > { %s701_s13 = sshll.u32 %s216_s12, 5 }
  0x33   : > { %s218_s14 = scalar_lea.vmem [#allocation7], %s701_s13 }
  0x34   : > { %777 = dma.done.wait (%p720_p6), [#allocation9], 16  }
  0x35   : > { %779 = vsyncadd (%p720_p6), [#allocation9], 4294967280 }
  0x36   : > { %226 = sfence }
  0x37   : > { %p253_p4 = scmp.lt.s32.totalorder %s839_s3, 1  ;;  %s263_s15 = ssub.s32 1, %s839_s3  ;;  %v273_v5 = vlaneseq  ;;  %v888_v6 = vld [vmem:[%s218_s14] sm:$0xff]  ;;  %v890_v7 = vld [vmem:[%s218_s14 + $0x8] sm:$0xff]  ;;  %v892_v8 = vld [vmem:[%s218_s14 + $0x10] sm:$0xff] }
  0x38   : > { %p894_p7 = scmp.lt.s32.totalorder %s263_s15, 0  ;;  %v270_v9 = vstv %s263_s15  ;;  %s703_s17 = sshll.u32 %s839_s3, 7  ;;  %v899_v10 = vld [vmem:[%s218_s14 + $0x18] sm:$0xff]  ;;  %v302_v11 = vmax.f32 %v888_v6, %v890_v7 }
  0x39   : > { %s1020_s3 = smov (!%p253_p4, %s839_s3), 1  ;;  %v280_v12 = vand.u32 127, %v273_v5  ;;  %v281_v13 = vstv %s703_s17  ;;  %v908_v14 = vshrl.u32 %v273_v5, 7  ;;  %v457_v16 = vmax.f32 %v892_v8, %v899_v10  ;;  %s292_s26 = sld [smem:[#allocation8]] }
  0x3a   : > { %s265_s19 = scalar_select %p894_p7, 0, 255  ;;  %v303_v15 = vrot.slane %v302_v11, 4  ;;  %vm271_vm0 = vcmp.lt.s32.totalorder %v270_v9, 0 }
  0x3b   : > { %s255_s24 = scalar_lea.vmem %s1010_s2, %s1020_s3  ;;  %v916_v17 = vadd.s32 %v281_v13, %v280_v12  ;;  %vm276_vm1 = vcmp.lt.s32.totalorder %v908_v14, 1  ;;  %v458_v19 = vrot.slane %v457_v16, 4  ;;  %v926_v30 = vadd.s32 8, %v908_v14  ;;  %s704_s27 = sld [smem:[#allocation8 + $0x1]] }
  0x3c   : > { %s266_s25 = sand.u32 1, %s265_s19  ;;  %v304_v18 = vmax.f32 %v302_v11, %v303_v15  ;;  %s705_s28 = sld [smem:[#allocation8 + $0x2]] }
  0x3d   : > { %v268_v20 = vld [vmem:[%s255_s24] sm:%s266_s25]  ;;  %vm283_vm2 = vcmp.lt.s32.totalorder %v916_v17, 200  ;;  %v459_v23 = vmax.f32 %v457_v16, %v458_v19  ;;  %s706_s29 = sld [smem:[#allocation8 + $0x3]]  ;;  %s707_s30 = sld [smem:[#allocation8 + $0x4]] }
  0x3e   : > { %v272_v21 = vsel %vm271_vm0, %v821_v0, %v268_v20  ;;  %v305_v22 = vrot.slane %v304_v18, 2  ;;  %s708_s5 = sld [smem:[#allocation8 + $0x5]]  ;;  %s262_s8 = scalar_lea.vmem %s1012_s4, %s1020_s3 }
  0x3f   : > { %v277_v24 = vsel %vm276_vm1, %v272_v21, %v821_v0  ;;  %v460_v27 = vrot.slane %v459_v23, 2  ;;  %v309_v2 = vstv %s292_s26 }
  0x40   : > { %v284_v25 = vsel %vm283_vm2, %v277_v24, %v821_v0  ;;  %v306_v26 = vmax.f32 %v304_v18, %v305_v22 }
  0x41   : > { %286 = vst [vmem:[#allocation10] sm:$0x1] %v284_v25  ;;  %v461_v29 = vmax.f32 %v459_v23, %v460_v27  ;;  %v338_v5 = vstv %s704_s27 }
  0x42   : > { %v307_v28 = vrot.slane %v306_v26, 1 }
  0x43   : > { %v462_v32 = vrot.slane %v461_v29, 1 }
  0x44   : > { %v308_v31 = vmax.f32 %v306_v26, %v307_v28 }
  0x45   : > { %v463_v33 = vmax.f32 %v461_v29, %v462_v32 }
  0x46   : > { %vm312_vm3 = vcmp.eq.f32.partialorder %v888_v6, %v308_v31  ;;  %vm313_vm4 = vcmp.eq.f32.partialorder %v890_v7, %v308_v31 }
  0x47   : > { %v314_v34 = vsel %vm312_vm3, %v908_v14, 16  ;;  %v315_v35 = vsel %vm313_vm4, %v926_v30, 16  ;;  %vm466_vm6 = vcmp.eq.f32.partialorder %v892_v8, %v463_v33  ;;  %vm467_vm7 = vcmp.eq.f32.partialorder %v899_v10, %v463_v33 }
  0x48   : > { %vm316_vm5 = vcmp.lt.s32.totalorder %v314_v34, %v315_v35  ;;  %v468_v37 = vsel %vm466_vm6, %v908_v14, 16  ;;  %v469_v38 = vsel %vm467_vm7, %v926_v30, 16  ;;  %v464_v11 = vmul.f32 %v463_v33, %v309_v2 }
  0x49   : > { %v317_v36 = vsel %vm316_vm5, %v314_v34, %v315_v35  ;;  %vm470_vm8 = vcmp.lt.s32.totalorder %v468_v37, %v469_v38 }
  0x4a   : > { %v318_v39 = vrot.slane %v317_v36, 4  ;;  %v471_v40 = vsel %vm470_vm8, %v468_v37, %v469_v38 }
  0x4b   : > { %v472_v41 = vrot.slane %v471_v40, 4 }
  0x4c   : > { %vm319_vm9 = vcmp.lt.s32.totalorder %v317_v36, %v318_v39 }
  0x4d   : > { %v320_v42 = vsel %vm319_vm9, %v317_v36, %v318_v39  ;;  %vm473_vm10 = vcmp.lt.s32.totalorder %v471_v40, %v472_v41 }
  0x4e   : > { %v321_v43 = vrot.slane %v320_v42, 2  ;;  %v474_v44 = vsel %vm473_vm10, %v471_v40, %v472_v41 }
  0x4f   : > { %v475_v45 = vrot.slane %v474_v44, 2 }
  0x50   : > { %vm322_vm11 = vcmp.lt.s32.totalorder %v320_v42, %v321_v43 }
  0x51   : > { %v323_v46 = vsel %vm322_vm11, %v320_v42, %v321_v43  ;;  %vm476_vm12 = vcmp.lt.s32.totalorder %v474_v44, %v475_v45 }
  0x52   : > { %v324_v47 = vrot.slane %v323_v46, 1  ;;  %v477_v48 = vsel %vm476_vm12, %v474_v44, %v475_v45 }
  0x53   : > { %v478_v49 = vrot.slane %v477_v48, 1 }
  0x54   : > { %vm325_vm13 = vcmp.lt.s32.totalorder %v323_v46, %v324_v47 }
  0x55   : > { %v326_v50 = vsel %vm325_vm13, %v323_v46, %v324_v47  ;;  %vm479_vm0 = vcmp.lt.s32.totalorder %v477_v48, %v478_v49 }
  0x56   : > { %vm327_vm14 = vcmp.eq.s32.totalorder %v908_v14, %v326_v50  ;;  %vm328_vm15 = vcmp.eq.s32.totalorder %v926_v30, %v326_v50  ;;  %v480_v53 = vsel %vm479_vm0, %v477_v48, %v478_v49  ;;  %v367_v50 = vstv %s705_s28 }
  0x57   : > { %v329_v51 = vsel %vm327_vm14, -inf, %v888_v6  ;;  %v330_v52 = vsel %vm328_vm15, -inf, %v890_v7  ;;  %vm481_vm1 = vcmp.eq.s32.totalorder %v908_v14, %v480_v53  ;;  %vm482_vm3 = vcmp.eq.s32.totalorder %v926_v30, %v480_v53 }
  0x58   : > { %v331_v54 = vmax.f32 %v329_v51, %v330_v52  ;;  %v483_v55 = vsel %vm481_vm1, -inf, %v892_v8  ;;  %v484_v56 = vsel %vm482_vm3, -inf, %v899_v10  ;;  %v310_v6 = vmul.f32 %v309_v2, %v308_v31 }
  0x59   : > { %v485_v58 = vmax.f32 %v483_v55, %v484_v56 }
  0x5a   : > { %v332_v57 = vrot.slane %v331_v54, 4 }
  0x5b   : > { %v486_v60 = vrot.slane %v485_v58, 4 }
  0x5c   : > { %v333_v59 = vmax.f32 %v331_v54, %v332_v57 }
  0x5d   : > { %v487_v62 = vmax.f32 %v485_v58, %v486_v60 }
  0x5e   : > { %v334_v61 = vrot.slane %v333_v59, 2 }
  0x5f   : > { %v488_v1 = vrot.slane %v487_v62, 2 }
  0x60   : > { %v335_v63 = vmax.f32 %v333_v59, %v334_v61 }
  0x61   : > { %v489_v4 = vmax.f32 %v487_v62, %v488_v1 }
  0x62   : > { %v336_v3 = vrot.slane %v335_v63, 1 }
  0x63   : > { %v490_v9 = vrot.slane %v489_v4, 1 }
  0x64   : > { %v337_v7 = vmax.f32 %v335_v63, %v336_v3 }
  0x65   : > { %v491_v10 = vmax.f32 %v489_v4, %v490_v9 }
  0x66   : > { %v339_v8 = vmul.f32 %v338_v5, %v337_v7  ;;  %vm341_vm4 = vcmp.eq.f32.partialorder %v329_v51, %v337_v7  ;;  %vm342_vm5 = vcmp.eq.f32.partialorder %v330_v52, %v337_v7 }
  0x67   : > { %v343_v12 = vsel %vm341_vm4, %v908_v14, 16  ;;  %v344_v13 = vsel %vm342_vm5, %v926_v30, 16  ;;  %v492_v16 = vmul.f32 %v491_v10, %v338_v5  ;;  %vm494_vm7 = vcmp.eq.f32.partialorder %v483_v55, %v491_v10 }
  0x68   : > { %v340_v15 = vadd.f32 %v339_v8, %v310_v6  ;;  %vm345_vm6 = vcmp.lt.s32.totalorder %v343_v12, %v344_v13  ;;  %vm495_vm8 = vcmp.eq.f32.partialorder %v484_v56, %v491_v10  ;;  %v496_v19 = vsel %vm494_vm7, %v908_v14, 16 }
  0x69   : > { %v346_v18 = vsel %vm345_vm6, %v343_v12, %v344_v13  ;;  %v493_v21 = vadd.f32 %v492_v16, %v464_v11  ;;  %v497_v22 = vsel %vm495_vm8, %v926_v30, 16 }
  0x6a   : > { %v347_v20 = vrot.slane %v346_v18, 4  ;;  %vm498_vm9 = vcmp.lt.s32.totalorder %v496_v19, %v497_v22 }
  0x6b   : > { %v499_v23 = vsel %vm498_vm9, %v496_v19, %v497_v22 }
  0x6c   : > { %vm348_vm10 = vcmp.lt.s32.totalorder %v346_v18, %v347_v20  ;;  %v500_v25 = vrot.slane %v499_v23, 4 }
  0x6d   : > { %v349_v24 = vsel %vm348_vm10, %v346_v18, %v347_v20 }
  0x6e   : > { %v350_v26 = vrot.slane %v349_v24, 2  ;;  %vm501_vm11 = vcmp.lt.s32.totalorder %v499_v23, %v500_v25 }
  0x6f   : > { %v502_v27 = vsel %vm501_vm11, %v499_v23, %v500_v25 }
  0x70   : > { %vm351_vm12 = vcmp.lt.s32.totalorder %v349_v24, %v350_v26  ;;  %v503_v29 = vrot.slane %v502_v27, 2 }
  0x71   : > { %v352_v28 = vsel %vm351_vm12, %v349_v24, %v350_v26 }
  0x72   : > { %v353_v31 = vrot.slane %v352_v28, 1  ;;  %vm504_vm13 = vcmp.lt.s32.totalorder %v502_v27, %v503_v29 }
  0x73   : > { %v505_v32 = vsel %vm504_vm13, %v502_v27, %v503_v29 }
  0x74   : > { %vm354_vm14 = vcmp.lt.s32.totalorder %v352_v28, %v353_v31  ;;  %v506_v34 = vrot.slane %v505_v32, 1 }
  0x75   : > { %v355_v33 = vsel %vm354_vm14, %v352_v28, %v353_v31 }
  0x76   : > { %vm356_vm15 = vcmp.eq.s32.totalorder %v908_v14, %v355_v33  ;;  %vm357_vm0 = vcmp.eq.s32.totalorder %v926_v30, %v355_v33  ;;  %vm507_vm1 = vcmp.lt.s32.totalorder %v505_v32, %v506_v34 }
  0x77   : > { %v358_v35 = vsel %vm356_vm15, -inf, %v329_v51  ;;  %v359_v36 = vsel %vm357_vm0, -inf, %v330_v52  ;;  %v508_v38 = vsel %vm507_vm1, %v505_v32, %v506_v34 }
  0x78   : > { %v360_v37 = vmax.f32 %v358_v35, %v359_v36  ;;  %vm509_vm3 = vcmp.eq.s32.totalorder %v908_v14, %v508_v38  ;;  %vm510_vm4 = vcmp.eq.s32.totalorder %v926_v30, %v508_v38 }
  0x79   : > { %v511_v40 = vsel %vm509_vm3, -inf, %v483_v55  ;;  %v512_v41 = vsel %vm510_vm4, -inf, %v484_v56 }
  0x7a   : > { %v361_v39 = vrot.slane %v360_v37, 4  ;;  %v513_v42 = vmax.f32 %v511_v40, %v512_v41 }
  0x7c   : > { %v362_v43 = vmax.f32 %v360_v37, %v361_v39  ;;  %v514_v44 = vrot.slane %v513_v42, 4 }
  0x7e   : > { %v363_v45 = vrot.slane %v362_v43, 2  ;;  %v515_v46 = vmax.f32 %v513_v42, %v514_v44 }
  0x80   : > { %v364_v47 = vmax.f32 %v362_v43, %v363_v45  ;;  %v516_v48 = vrot.slane %v515_v46, 2 }
  0x82   : > { %v365_v49 = vrot.slane %v364_v47, 1  ;;  %v517_v51 = vmax.f32 %v515_v46, %v516_v48 }
  0x84   : > { %v366_v52 = vmax.f32 %v364_v47, %v365_v49  ;;  %v518_v53 = vrot.slane %v517_v51, 1 }
  0x86   : > { %v368_v54 = vmul.f32 %v367_v50, %v366_v52  ;;  %vm370_vm5 = vcmp.eq.f32.partialorder %v358_v35, %v366_v52  ;;  %vm371_vm6 = vcmp.eq.f32.partialorder %v359_v36, %v366_v52  ;;  %v519_v56 = vmax.f32 %v517_v51, %v518_v53 }
  0x87   : > { %v372_v57 = vsel %vm370_vm5, %v908_v14, 16  ;;  %v373_v55 = vsel %vm371_vm6, %v926_v30, 16 }
  0x88   : > { %v954_v58 = vadd.f32 %v368_v54, %v340_v15  ;;  %vm374_vm7 = vcmp.lt.s32.totalorder %v372_v57, %v373_v55  ;;  %v520_v60 = vmul.f32 %v519_v56, %v367_v50  ;;  %vm522_vm8 = vcmp.eq.f32.partialorder %v511_v40, %v519_v56 }
  0x89   : > { %v375_v59 = vsel %vm374_vm7, %v372_v57, %v373_v55  ;;  %vm523_vm9 = vcmp.eq.f32.partialorder %v512_v41, %v519_v56  ;;  %v524_v62 = vsel %vm522_vm8, %v908_v14, 16 }
  0x8a   : > { %v376_v61 = vrot.slane %v375_v59, 4  ;;  %v525_v63 = vsel %vm523_vm9, %v926_v30, 16  ;;  %v958_v1 = vadd.f32 %v520_v60, %v493_v21 }
  0x8b   : > { %vm526_vm10 = vcmp.lt.s32.totalorder %v524_v62, %v525_v63 }
  0x8c   : > { %vm377_vm11 = vcmp.lt.s32.totalorder %v375_v59, %v376_v61  ;;  %v527_v2 = vsel %vm526_vm10, %v524_v62, %v525_v63 }
  0x8d   : > { %v378_v3 = vsel %vm377_vm11, %v375_v59, %v376_v61  ;;  %v528_v4 = vrot.slane %v527_v2, 4 }
  0x8e   : > { %v379_v5 = vrot.slane %v378_v3, 2 }
  0x8f   : > { %vm529_vm12 = vcmp.lt.s32.totalorder %v527_v2, %v528_v4 }
  0x90   : > { %vm380_vm13 = vcmp.lt.s32.totalorder %v378_v3, %v379_v5  ;;  %v530_v6 = vsel %vm529_vm12, %v527_v2, %v528_v4 }
  0x91   : > { %v381_v7 = vsel %vm380_vm13, %v378_v3, %v379_v5  ;;  %v531_v9 = vrot.slane %v530_v6, 2 }
  0x92   : > { %v382_v11 = vrot.slane %v381_v7, 1 }
  0x93   : > { %vm532_vm14 = vcmp.lt.s32.totalorder %v530_v6, %v531_v9 }
  0x94   : > { %vm383_vm15 = vcmp.lt.s32.totalorder %v381_v7, %v382_v11  ;;  %v533_v8 = vsel %vm532_vm14, %v530_v6, %v531_v9 }
  0x95   : > { %v384_v10 = vsel %vm383_vm15, %v381_v7, %v382_v11  ;;  %v534_v12 = vrot.slane %v533_v8, 1 }
  0x96   : > { %vm385_vm0 = vcmp.eq.s32.totalorder %v908_v14, %v384_v10  ;;  %vm386_vm1 = vcmp.eq.s32.totalorder %v926_v30, %v384_v10 }
  0x97   : > { %v387_v13 = vsel %vm385_vm0, -inf, %v358_v35  ;;  %v388_v15 = vsel %vm386_vm1, -inf, %v359_v36  ;;  %vm535_vm3 = vcmp.lt.s32.totalorder %v533_v8, %v534_v12 }
  0x98   : > { %v389_v16 = vmax.f32 %v387_v13, %v388_v15  ;;  %v536_v18 = vsel %vm535_vm3, %v533_v8, %v534_v12 }
  0x99   : > { %vm537_vm4 = vcmp.eq.s32.totalorder %v908_v14, %v536_v18  ;;  %vm538_vm5 = vcmp.eq.s32.totalorder %v926_v30, %v536_v18 }
  0x9a   : > { %v390_v19 = vrot.slane %v389_v16, 4  ;;  %v539_v20 = vsel %vm537_vm4, -inf, %v511_v40  ;;  %v540_v21 = vsel %vm538_vm5, -inf, %v512_v41 }
  0x9b   : > { %v541_v22 = vmax.f32 %v539_v20, %v540_v21 }
  0x9c   : > { %v391_v23 = vmax.f32 %v389_v16, %v390_v19 }
  0x9d   : > { %v542_v24 = vrot.slane %v541_v22, 4 }
  0x9e   : > { %v392_v25 = vrot.slane %v391_v23, 2 }
  0x9f   : > { %v543_v26 = vmax.f32 %v541_v22, %v542_v24 }
  0xa0   : > { %v393_v27 = vmax.f32 %v391_v23, %v392_v25 }
  0xa1   : > { %v544_v28 = vrot.slane %v543_v26, 2 }
  0xa2   : > { %v394_v29 = vrot.slane %v393_v27, 1 }
  0xa3   : > { %v545_v31 = vmax.f32 %v543_v26, %v544_v28 }
  0xa4   : > { %v964_v32 = vmax.f32 %v393_v27, %v394_v29 }
  0xa5   : > { %v546_v33 = vrot.slane %v545_v31, 1 }
  0xa6   : > { %vm399_vm6 = vcmp.eq.f32.partialorder %v387_v13, %v964_v32  ;;  %vm400_vm7 = vcmp.eq.f32.partialorder %v388_v15, %v964_v32 }
  0xa7   : > { %v401_v34 = vsel %vm399_vm6, %v908_v14, 16  ;;  %v402_v35 = vsel %vm400_vm7, %v926_v30, 16  ;;  %v970_v36 = vmax.f32 %v545_v31, %v546_v33 }
  0xa8   : > { %vm403_vm8 = vcmp.lt.s32.totalorder %v401_v34, %v402_v35 }
  0xa9   : > { %v404_v37 = vsel %vm403_vm8, %v401_v34, %v402_v35  ;;  %vm550_vm9 = vcmp.eq.f32.partialorder %v539_v20, %v970_v36  ;;  %vm551_vm10 = vcmp.eq.f32.partialorder %v540_v21, %v970_v36  ;;  %v396_v35 = vstv %s706_s29 }
  0xaa   : > { %v405_v38 = vrot.slane %v404_v37, 4  ;;  %v552_v39 = vsel %vm550_vm9, %v908_v14, 16  ;;  %v553_v40 = vsel %vm551_vm10, %v926_v30, 16 }
  0xab   : > { %vm554_vm11 = vcmp.lt.s32.totalorder %v552_v39, %v553_v40 }
  0xac   : > { %vm406_vm12 = vcmp.lt.s32.totalorder %v404_v37, %v405_v38  ;;  %v555_v41 = vsel %vm554_vm11, %v552_v39, %v553_v40 }
  0xad   : > { %v407_v42 = vsel %vm406_vm12, %v404_v37, %v405_v38  ;;  %v556_v43 = vrot.slane %v555_v41, 4 }
  0xae   : > { %v408_v44 = vrot.slane %v407_v42, 2 }
  0xaf   : > { %vm557_vm13 = vcmp.lt.s32.totalorder %v555_v41, %v556_v43 }
  0xb0   : > { %vm409_vm14 = vcmp.lt.s32.totalorder %v407_v42, %v408_v44  ;;  %v558_v45 = vsel %vm557_vm13, %v555_v41, %v556_v43 }
  0xb1   : > { %v410_v46 = vsel %vm409_vm14, %v407_v42, %v408_v44  ;;  %v559_v47 = vrot.slane %v558_v45, 2  ;;  %v397_v42 = vmul.f32 %v396_v35, %v964_v32  ;;  %v425_v44 = vstv %s707_s30 }
  0xb2   : > { %v411_v48 = vrot.slane %v410_v46, 1 }
  0xb3   : > { %vm560_vm15 = vcmp.lt.s32.totalorder %v558_v45, %v559_v47 }
  0xb4   : > { %vm412_vm0 = vcmp.lt.s32.totalorder %v410_v46, %v411_v48  ;;  %v561_v49 = vsel %vm560_vm15, %v558_v45, %v559_v47 }
  0xb5   : > { %v413_v50 = vsel %vm412_vm0, %v410_v46, %v411_v48  ;;  %v562_v51 = vrot.slane %v561_v49, 1  ;;  %v548_v46 = vmul.f32 %v970_v36, %v396_v35 }
  0xb6   : > { %vm414_vm1 = vcmp.eq.s32.totalorder %v908_v14, %v413_v50  ;;  %vm415_vm3 = vcmp.eq.s32.totalorder %v926_v30, %v413_v50 }
  0xb7   : > { %v416_v52 = vsel %vm414_vm1, -inf, %v387_v13  ;;  %v417_v53 = vsel %vm415_vm3, -inf, %v388_v15  ;;  %vm563_vm4 = vcmp.lt.s32.totalorder %v561_v49, %v562_v51 }
  0xb8   : > { %v418_v54 = vmax.f32 %v416_v52, %v417_v53  ;;  %v564_v57 = vsel %vm563_vm4, %v561_v49, %v562_v51  ;;  %v454_v51 = vstv %s708_s5 }
  0xb9   : > { %vm565_vm5 = vcmp.eq.s32.totalorder %v908_v14, %v564_v57  ;;  %vm566_vm6 = vcmp.eq.s32.totalorder %v926_v30, %v564_v57 }
  0xba   : > { %v419_v55 = vrot.slane %v418_v54, 4  ;;  %v567_v56 = vsel %vm565_vm5, -inf, %v539_v20  ;;  %v568_v59 = vsel %vm566_vm6, -inf, %v540_v21 }
  0xbb   : > { %v569_v60 = vmax.f32 %v567_v56, %v568_v59 }
  0xbc   : > { %v420_v61 = vmax.f32 %v418_v54, %v419_v55 }
  0xbd   : > { %v570_v62 = vrot.slane %v569_v60, 4 }
  0xbe   : > { %v421_v63 = vrot.slane %v420_v61, 2 }
  0xbf   : > { %v571_v2 = vmax.f32 %v569_v60, %v570_v62 }
  0xc0   : > { %v422_v3 = vmax.f32 %v420_v61, %v421_v63 }
  0xc1   : > { %v572_v4 = vrot.slane %v571_v2, 2 }
  0xc2   : > { %v423_v5 = vrot.slane %v422_v3, 1 }
  0xc3   : > { %v573_v6 = vmax.f32 %v571_v2, %v572_v4  ;;  %v607_v2 = vld [vmem:[#allocation10] sm:$0x1] }
  0xc4   : > { %v424_v7 = vmax.f32 %v422_v3, %v423_v5 }
  0xc5   : > { %v574_v9 = vrot.slane %v573_v6, 1 }
  0xc6   : > { %vm428_vm7 = vcmp.eq.f32.partialorder %v416_v52, %v424_v7  ;;  %vm429_vm8 = vcmp.eq.f32.partialorder %v417_v53, %v424_v7  ;;  %v426_v49 = vmul.f32 %v425_v44, %v424_v7 }
  0xc7   : > { %v430_v11 = vsel %vm428_vm7, %v908_v14, 16  ;;  %v431_v8 = vsel %vm429_vm8, %v926_v30, 16  ;;  %v575_v10 = vmax.f32 %v573_v6, %v574_v9 }
  0xc8   : > { %vm432_vm9 = vcmp.lt.s32.totalorder %v430_v11, %v431_v8 }
  0xc9   : > { %v433_v12 = vsel %vm432_vm9, %v430_v11, %v431_v8  ;;  %vm578_vm10 = vcmp.eq.f32.partialorder %v567_v56, %v575_v10  ;;  %vm579_vm11 = vcmp.eq.f32.partialorder %v568_v59, %v575_v10 }
  0xca   : > { %v434_v13 = vrot.slane %v433_v12, 4  ;;  %v580_v15 = vsel %vm578_vm10, %v908_v14, 16  ;;  %v581_v16 = vsel %vm579_vm11, %v926_v30, 16 }
  0xcb   : > { %vm582_vm12 = vcmp.lt.s32.totalorder %v580_v15, %v581_v16 }
  0xcc   : > { %vm435_vm13 = vcmp.lt.s32.totalorder %v433_v12, %v434_v13  ;;  %v583_v18 = vsel %vm582_vm12, %v580_v15, %v581_v16 }
  0xcd   : > { %v436_v19 = vsel %vm435_vm13, %v433_v12, %v434_v13  ;;  %v584_v20 = vrot.slane %v583_v18, 4 }
  0xce   : > { %v437_v21 = vrot.slane %v436_v19, 2 }
  0xcf   : > { %vm585_vm14 = vcmp.lt.s32.totalorder %v583_v18, %v584_v20 }
  0xd0   : > { %vm438_vm15 = vcmp.lt.s32.totalorder %v436_v19, %v437_v21  ;;  %v586_v22 = vsel %vm585_vm14, %v583_v18, %v584_v20 }
  0xd1   : > { %v439_v23 = vsel %vm438_vm15, %v436_v19, %v437_v21  ;;  %v587_v24 = vrot.slane %v586_v22, 2 }
  0xd2   : > { %v440_v25 = vrot.slane %v439_v23, 1 }
  0xd3   : > { %vm588_vm0 = vcmp.lt.s32.totalorder %v586_v22, %v587_v24 }
  0xd4   : > { %vm441_vm1 = vcmp.lt.s32.totalorder %v439_v23, %v440_v25  ;;  %v589_v26 = vsel %vm588_vm0, %v586_v22, %v587_v24 }
  0xd5   : > { %v442_v27 = vsel %vm441_vm1, %v439_v23, %v440_v25  ;;  %v590_v28 = vrot.slane %v589_v26, 1 }
  0xd6   : > { %vm443_vm3 = vcmp.eq.s32.totalorder %v908_v14, %v442_v27  ;;  %vm444_vm4 = vcmp.eq.s32.totalorder %v926_v30, %v442_v27 }
  0xd7   : > { %v445_v29 = vsel %vm443_vm3, -inf, %v416_v52  ;;  %v446_v31 = vsel %vm444_vm4, -inf, %v417_v53  ;;  %vm591_vm5 = vcmp.lt.s32.totalorder %v589_v26, %v590_v28  ;;  %v549_v52 = vadd.f32 %v548_v46, %v958_v1 }
  0xd8   : > { %v447_v33 = vmax.f32 %v445_v29, %v446_v31  ;;  %v592_v34 = vsel %vm591_vm5, %v589_v26, %v590_v28  ;;  %v576_v53 = vmul.f32 %v575_v10, %v425_v44 }
  0xd9   : > { %vm593_vm6 = vcmp.eq.s32.totalorder %v908_v14, %v592_v34  ;;  %vm594_vm7 = vcmp.eq.s32.totalorder %v926_v30, %v592_v34  ;;  %v398_v14 = vadd.f32 %v397_v42, %v954_v58 }
  0xda   : > { %v448_v37 = vrot.slane %v447_v33, 4  ;;  %v595_v38 = vsel %vm593_vm6, -inf, %v567_v56  ;;  %v596_v39 = vsel %vm594_vm7, -inf, %v568_v59  ;;  %v577_v59 = vadd.f32 %v576_v53, %v549_v52 }
  0xdb   : > { %v597_v40 = vmax.f32 %v595_v38, %v596_v39  ;;  %v427_v32 = vadd.f32 %v426_v49, %v398_v14 }
  0xdc   : > { %v449_v41 = vmax.f32 %v447_v33, %v448_v37 }
  0xdd   : > { %v598_v43 = vrot.slane %v597_v40, 4 }
  0xde   : > { %v450_v45 = vrot.slane %v449_v41, 2 }
  0xdf   : > { %v599_v47 = vmax.f32 %v597_v40, %v598_v43 }
  0xe0   : > { %v451_v48 = vmax.f32 %v449_v41, %v450_v45 }
  0xe1   : > { %v600_v30 = vrot.slane %v599_v47, 2 }
  0xe2   : > { %v452_v50 = vrot.slane %v451_v48, 1 }
  0xe3   : > { %v601_v54 = vmax.f32 %v599_v47, %v600_v30 }
  0xe4   : > { %v453_v57 = vmax.f32 %v451_v48, %v452_v50 }
  0xe5   : > { %v602_v55 = vrot.slane %v601_v54, 1 }
  0xe6   : > { %v455_v56 = vmul.f32 %v454_v51, %v453_v57 }
  0xe7   : > { %v603_v60 = vmax.f32 %v601_v54, %v602_v55 }
  0xe8   : > { %v456_v36 = vadd.f32 %v455_v56, %v427_v32 }
  0xe9   : > { %v604_v61 = vmul.f32 %v603_v60, %v454_v51 }
  0xeb   : > { %v605_v62 = vadd.f32 %v604_v61, %v577_v59 }
  0xed   : > { %v606_v63 = vsub.f32 %v456_v36, %v605_v62 }
  0xef   : > { %v608_v58 = vmul.f32 0.5, %v606_v63 }
  0xf1   : > { %747 = vtanh.f32 %v608_v58 }
  0xfb   : > { %v748_v3 = vpop.eup %747 }
  0xfc   : > { %v610_v4 = vsub.f32 %v748_v3, %v607_v2 }
  0xfe   : > { %v611_v1 = vand.u32 2147483647, %v610_v4 }
 0x100   : > { %v617_v5 = vsel %vm283_vm2, %v611_v1, 0.0 }
 0x101   : > { %618 = vst [vmem:[%s262_s8] sm:$0x1] %v617_v5 }
 0x102 PF: > { %p13_p6 = scmp.ge.s32.totalorder %s842_s20, 4   ;;  %s1016_s17 = smov %s786_s18 }
 0x103   : > { %s1017_s18 = smov %s852_s23  ;;  %s1018_s19 = smov %s842_s20 }
 0x104   :  { %15 = sbr.rel (!%p13_p6) target bundleno = 4 (0x4), region = 113 }
 0x10b   :  { %636 = vsyncpa [#allocation9], 1 }
 0x10c   :  { %638 = vsyncpa [#allocation9 + $0x1], 1 }

</bundles_post_ra>
